<compile_context>
chip_gen: v7x
topology: tpu7x:2x2x1
jax: 0.10.0
libtpu: 0.0.40
codegen_flags: <defaults>
</compile_context>

<pallas_src>
import jax
import jax.numpy as jnp
from jax.experimental import pallas as pl
from jax.experimental.pallas import tpu as pltpu


def _round_up(v, m):
    return (v + m - 1) // m * m


# -----------------------------------------------------------------------------
# Kernel: one (batch tile, hidden tile) per grid step.
#   grid = (batch_tiles, hidden_tiles)   -- hidden (reduction of fc2) is last.
#   acc_ref: (tb, out) f32 scratch, resident across the hidden axis.
# -----------------------------------------------------------------------------
def tower_kernel(x_ref, w1_ref, b1_ref, w2_ref, b2_ref, o_ref, acc_ref):
    k = pl.program_id(1)

    @pl.when(k == 0)
    def _init():
        acc_ref[...] = jnp.zeros_like(acc_ref)

    # fc1 slice: (tb, in) @ (in, th) -> (tb, th); MXU matmul, f32 accumulate.
    # The cast to the weight dtype happens here (no extra HBM pass over x).
    x = x_ref[...].astype(w1_ref.dtype)
    h = jnp.dot(x, w1_ref[...], preferred_element_type=jnp.float32)
    h = jnp.maximum(h + b1_ref[...], 0.0)          # bias + ReLU in f32 (VPU)

    # fc2 partial: (tb, th) @ (th, out), accumulated over hidden tiles.
    acc_ref[...] += jnp.dot(h.astype(w2_ref.dtype), w2_ref[...],
                            preferred_element_type=jnp.float32)

    @pl.when(k == pl.num_programs(1) - 1)
    def _finalize():
        o_ref[...] = (acc_ref[...] + b2_ref[...]).astype(o_ref.dtype)


# -----------------------------------------------------------------------------
# One-time (hoisted) parameter preparation.  Call once, cache, reuse per step.
#   w1: (hidden, in), b1: (hidden,), w2: (out, hidden), b2: (out,)  [PyTorch layout]
# Set compute_dtype=jnp.float32 if f32 parity with the PyTorch module is needed.
# -----------------------------------------------------------------------------
def prepare_tower_params(w1, b1, w2, b2, *, compute_dtype=jnp.bfloat16):
    w1_t = jnp.asarray(w1).T.astype(compute_dtype)              # (in, hidden)
    w2_t = jnp.asarray(w2).T.astype(compute_dtype)              # (hidden, out)
    b1_2d = jnp.asarray(b1).reshape(1, -1).astype(jnp.float32)  # (1, hidden)
    b2_2d = jnp.asarray(b2).reshape(1, -1).astype(jnp.float32)  # (1, out)
    return w1_t, b1_2d, w2_t, b2_2d


def tower_forward(x, w1_t, b1, w2_t, b2, *, batch_tile=256, hidden_tile=512,
                  out_dtype=None):
    """x: (B, in); w1_t: (in, hidden); b1: (1, hidden);
    w2_t: (hidden, out); b2: (1, out)  ->  (B, out) in out_dtype (default x.dtype)."""
    B, in_size = x.shape
    in_w, hidden = w1_t.shape
    hid_w, out_size = w2_t.shape
    assert in_w == in_size and hid_w == hidden and b1.shape == (1, hidden) \
        and b2.shape == (1, out_size)
    out_dtype = x.dtype if out_dtype is None else out_dtype

    # ---- batch tile: multiple of 16, >=2 grid steps when the batch allows
    # (megacore sharding), rebalanced so batch-padding waste stays bounded.
    B16 = _round_up(B, 16)
    tb = min(_round_up(max(batch_tile, 16), 16), B16)
    steps = pl.cdiv(B16, tb)
    if steps < 2 and B16 > 16:
        steps = 2
    tb = _round_up(pl.cdiv(B16, steps), 16)
    B_p = _round_up(B, tb)

    # ---- hidden tile: keep both weights resident when small, otherwise tile
    # the hidden dim (must then be a multiple of 128 per the (8,128) rule).
    if hidden <= hidden_tile or hidden % 128 != 0:
        th = hidden
    else:
        th = max(128, (min(hidden_tile, hidden) // 128) * 128)
        while hidden % th:
            th -= 128
    n_hid = hidden // th

    # Only the batch dim is ever padded (at most tb-1 zero rows).  Feature dims
    # use full-extent blocks, so there is no pad/cast pass over x, the weights,
    # or the output.  (Padded batch rows compute garbage and are sliced off.)
    x_p = x if B_p == B else jnp.zeros((B_p, in_size), x.dtype).at[:B].set(x)

    # Constant-index (resident) operands only need a single VMEM buffer.
    resident = pl.Buffered(1) if n_hid == 1 else None

    grid = (B_p // tb, n_hid)

    # ---- VMEM budget (per-TC; clamp to 64 MiB so it also holds on v7x).
    wt = jnp.dtype(w1_t.dtype).itemsize
    w_bufs = 1 if n_hid == 1 else 2
    vmem_bytes = (
        w_bufs * (in_size * th + th * out_size) * wt           # W1 / W2 blocks
        + w_bufs * th * 4 + out_size * 4                       # b1 / b2 blocks
        + 2 * tb * in_size * jnp.dtype(x.dtype).itemsize       # x double buffer
        + 2 * tb * out_size * jnp.dtype(out_dtype).itemsize    # out double buffer
        + tb * out_size * 4                                    # f32 accumulator
        + 2 * tb * th * 4                                      # h + recast temp
    )
    vmem_limit = int(min(max(2 * vmem_bytes, 32 << 20), 64 << 20))

    cost = pl.CostEstimate(
        flops=2 * B_p * (in_size * hidden + hidden * out_size),
        transcendentals=0,
        bytes_accessed=(B_p * in_size * jnp.dtype(x.dtype).itemsize
                        + (in_size * hidden + hidden * out_size) * wt
                        + (hidden + out_size) * 4
                        + B_p * out_size * jnp.dtype(out_dtype).itemsize),
    )

    out = pl.pallas_call(
        tower_kernel,
        out_shape=jax.ShapeDtypeStruct((B_p, out_size), out_dtype),
        grid_spec=pltpu.PrefetchScalarGridSpec(
            num_scalar_prefetch=0,
            grid=grid,
            in_specs=[
                pl.BlockSpec((tb, in_size), lambda i, k: (i, 0)),          # x tile
                pl.BlockSpec((in_size, th), lambda i, k: (0, k),
                             pipeline_mode=resident),                       # W1^T
                pl.BlockSpec((1, th), lambda i, k: (0, k),
                             pipeline_mode=resident),                       # b1
                pl.BlockSpec((th, out_size), lambda i, k: (k, 0),
                             pipeline_mode=resident),                       # W2^T
                pl.BlockSpec((1, out_size), lambda i, k: (0, 0),
                             pipeline_mode=resident),                       # b2
            ],
            out_specs=pl.BlockSpec((tb, out_size), lambda i, k: (i, 0)),
            scratch_shapes=[pltpu.VMEM((tb, out_size), jnp.float32)],
        ),
        compiler_params=pltpu.CompilerParams(
            dimension_semantics=("parallel", "arbitrary"),
            vmem_limit_bytes=vmem_limit),
        cost_estimate=cost,
    )(x_p, w1_t, b1, w2_t, b2)

    return out if B_p == B else out[:B]


if __name__ == "__main__":
    # Shapes consistent with Tower(input_size=32, output_size=8, hidden_size=64).
    batch, input_size, hidden_size, output_size = 256, 32, 64, 8

    key = jax.random.PRNGKey(0)
    kx, k1, k2, k3, k4 = jax.random.split(key, 5)
    x = jax.random.normal(kx, (batch, input_size), jnp.float32)

    # nn.Linear-style init in PyTorch layout: weight (out_features, in_features).
    lim1 = 1.0 / (input_size ** 0.5)
    lim2 = 1.0 / (hidden_size ** 0.5)
    w1 = jax.random.uniform(k1, (hidden_size, input_size), jnp.float32, -lim1, lim1)
    b1 = jax.random.uniform(k2, (hidden_size,), jnp.float32, -lim1, lim1)
    w2 = jax.random.uniform(k3, (output_size, hidden_size), jnp.float32, -lim2, lim2)
    b2 = jax.random.uniform(k4, (output_size,), jnp.float32, -lim2, lim2)

    # Pure-JAX f32 reference of the module forward (fc1 -> ReLU -> fc2).
    ref = jnp.maximum(x @ w1.T + b1, 0.0) @ w2.T + b2

    # Hoisted, one-time parameter prep (transpose + cast happens once, not per call).
    params_bf16 = prepare_tower_params(w1, b1, w2, b2, compute_dtype=jnp.bfloat16)
    params_f32 = prepare_tower_params(w1, b1, w2, b2, compute_dtype=jnp.float32)

    out_bf16 = jax.block_until_ready(tower_forward(x, *params_bf16, batch_tile=256))
    out_f32 = jax.block_until_ready(tower_forward(x, *params_f32, batch_tile=256))

    assert out_bf16.shape == (batch, output_size)
    assert out_f32.shape == (batch, output_size)

    # bf16 weights/activations on the MXU -> relaxed tolerance; f32 path tighter.
    err_bf16 = float(jnp.max(jnp.abs(out_bf16 - ref)))
    err_f32 = float(jnp.max(jnp.abs(out_f32 - ref)))
    assert jnp.allclose(out_bf16, ref, atol=5e-2, rtol=5e-2), \
        f"bf16 path mismatch vs reference (max abs err {err_bf16})"
    assert jnp.allclose(out_f32, ref, atol=2e-2, rtol=2e-2), \
        f"f32 path mismatch vs reference (max abs err {err_f32})"

    print("KERNEL_OK")
</pallas_src>

<mosaic_0001>
module attributes {stable_mosaic.version = 11 : i64} {
  func.func @tower_kernel(%arg0: i32, %arg1: i32, %arg2: memref<128x32xf32, #tpu.memory_space<vmem>>, %arg3: memref<32x64xbf16, #tpu.memory_space<vmem>>, %arg4: memref<1x64xf32, #tpu.memory_space<vmem>>, %arg5: memref<64x8xbf16, #tpu.memory_space<vmem>>, %arg6: memref<1x8xf32, #tpu.memory_space<vmem>>, %arg7: memref<128x8xf32, #tpu.memory_space<vmem>>, %arg8: memref<128x8xf32, #tpu.memory_space<vmem>>) attributes {dimension_semantics = [#tpu.dimension_semantics<parallel>, #tpu.dimension_semantics<arbitrary>], iteration_bounds = array<i64: 2, 1>, scalar_prefetch = 0 : i64, scratch_operands = 1 : i64, tpu.core_type = #tpu.core_type<tc>, window_params = [{transform_indices = @transform_0, window_bounds = array<i64: 128, 32>}, {pipeline_mode = #tpu.pipeline_mode<synchronous>, transform_indices = @transform_1, window_bounds = array<i64: 32, 64>}, {pipeline_mode = #tpu.pipeline_mode<synchronous>, transform_indices = @transform_2, window_bounds = array<i64: 1, 64>}, {pipeline_mode = #tpu.pipeline_mode<synchronous>, transform_indices = @transform_3, window_bounds = array<i64: 64, 8>}, {pipeline_mode = #tpu.pipeline_mode<synchronous>, transform_indices = @transform_4, window_bounds = array<i64: 1, 8>}, {transform_indices = @transform_5, window_bounds = array<i64: 128, 8>}]} {
    %c0_i32 = arith.constant 0 : i32
    %0 = arith.cmpi eq, %arg1, %c0_i32 : i32
    %1 = arith.extui %0 : i1 to i32
    %c0_i32_0 = arith.constant 0 : i32
    %2 = arith.cmpi ne, %1, %c0_i32_0 : i32
    scf.if %2 {
      %cst_16 = arith.constant 0.000000e+00 : f32
      %21 = vector.broadcast %cst_16 : f32 to vector<128x8xf32>
      %c0_17 = arith.constant 0 : index
      %c0_18 = arith.constant 0 : index
      %22 = vector.load %arg8[%c0_17, %c0_18] : memref<128x8xf32, #tpu.memory_space<vmem>>, vector<128x8xf32>
      tpu.vector_store %arg8[%c0_17, %c0_18], %21 {strides = array<i32>} : memref<128x8xf32, #tpu.memory_space<vmem>>, vector<128x8xf32>,
    } else {
    }
    %c0 = arith.constant 0 : index
    %c0_1 = arith.constant 0 : index
    %3 = vector.load %arg2[%c0, %c0_1] : memref<128x32xf32, #tpu.memory_space<vmem>>, vector<128x32xf32>
    %4 = arith.truncf %3 : vector<128x32xf32> to vector<128x32xbf16>
    %c0_2 = arith.constant 0 : index
    %c0_3 = arith.constant 0 : index
    %5 = vector.load %arg3[%c0_2, %c0_3] : memref<32x64xbf16, #tpu.memory_space<vmem>>, vector<32x64xbf16>
    %cst = arith.constant dense<0.000000e+00> : vector<128x64xf32>
    %6 = tpu.matmul %4, %5, %cst {dimension_numbers = #tpu.dot_dimension_numbers<[1], [0], [0], [1], [0, 0, 1, 1], [], []>} : vector<128x32xbf16>, vector<32x64xbf16>, vector<128x64xf32> -> vector<128x64xf32>
    %c0_4 = arith.constant 0 : index
    %c0_5 = arith.constant 0 : index
    %7 = vector.load %arg4[%c0_4, %c0_5] : memref<1x64xf32, #tpu.memory_space<vmem>>, vector<1x64xf32>
    %8 = vector.broadcast %7 : vector<1x64xf32> to vector<128x64xf32>
    %9 = arith.addf %6, %8 : vector<128x64xf32>
    %cst_6 = arith.constant 0.000000e+00 : f32
    %10 = vector.broadcast %cst_6 : f32 to vector<128x64xf32>
    %11 = arith.maximumf %9, %10 : vector<128x64xf32>
    %c0_7 = arith.constant 0 : index
    %c0_8 = arith.constant 0 : index
    %12 = vector.load %arg8[%c0_7, %c0_8] : memref<128x8xf32, #tpu.memory_space<vmem>>, vector<128x8xf32>
    %13 = arith.truncf %11 : vector<128x64xf32> to vector<128x64xbf16>
    %c0_9 = arith.constant 0 : index
    %c0_10 = arith.constant 0 : index
    %14 = vector.load %arg5[%c0_9, %c0_10] : memref<64x8xbf16, #tpu.memory_space<vmem>>, vector<64x8xbf16>
    %cst_11 = arith.constant dense<0.000000e+00> : vector<128x8xf32>
    %15 = tpu.matmul %13, %14, %cst_11 {dimension_numbers = #tpu.dot_dimension_numbers<[1], [0], [0], [1], [0, 0, 1, 1], [], []>} : vector<128x64xbf16>, vector<64x8xbf16>, vector<128x8xf32> -> vector<128x8xf32>
    %16 = arith.addf %12, %15 : vector<128x8xf32>
    %c0_12 = arith.constant 0 : index
    %c0_13 = arith.constant 0 : index
    %17 = vector.load %arg8[%c0_12, %c0_13] : memref<128x8xf32, #tpu.memory_space<vmem>>, vector<128x8xf32>
    tpu.vector_store %arg8[%c0_12, %c0_13], %16 {strides = array<i32>} : memref<128x8xf32, #tpu.memory_space<vmem>>, vector<128x8xf32>,
    %c0_i32_14 = arith.constant 0 : i32
    %18 = arith.cmpi eq, %arg1, %c0_i32_14 : i32
    %19 = arith.extui %18 : i1 to i32
    %c0_i32_15 = arith.constant 0 : i32
    %20 = arith.cmpi ne, %19, %c0_i32_15 : i32
    scf.if %20 {
      %c0_16 = arith.constant 0 : index
      %c0_17 = arith.constant 0 : index
      %21 = vector.load %arg8[%c0_16, %c0_17] : memref<128x8xf32, #tpu.memory_space<vmem>>, vector<128x8xf32>
      %c0_18 = arith.constant 0 : index
      %c0_19 = arith.constant 0 : index
      %22 = vector.load %arg6[%c0_18, %c0_19] : memref<1x8xf32, #tpu.memory_space<vmem>>, vector<1x8xf32>
      %23 = vector.broadcast %22 : vector<1x8xf32> to vector<128x8xf32>
      %24 = arith.addf %21, %23 : vector<128x8xf32>
      %c0_20 = arith.constant 0 : index
      %c0_21 = arith.constant 0 : index
      %25 = vector.load %arg7[%c0_20, %c0_21] : memref<128x8xf32, #tpu.memory_space<vmem>>, vector<128x8xf32>
      tpu.vector_store %arg7[%c0_20, %c0_21], %24 {strides = array<i32>} : memref<128x8xf32, #tpu.memory_space<vmem>>, vector<128x8xf32>,
    } else {
    }
    return
  }
  func.func @transform_0(%arg0: i32, %arg1: i32) -> (i32, i32) {
    %c0_i32 = arith.constant 0 : i32
    %c0_i32_0 = arith.constant 0 : i32
    return %arg0, %c0_i32 : i32, i32
  }
  func.func @transform_1(%arg0: i32, %arg1: i32) -> (i32, i32) {
    %c0_i32 = arith.constant 0 : i32
    %c0_i32_0 = arith.constant 0 : i32
    return %c0_i32, %arg1 : i32, i32
  }
  func.func @transform_2(%arg0: i32, %arg1: i32) -> (i32, i32) {
    %c0_i32 = arith.constant 0 : i32
    %c0_i32_0 = arith.constant 0 : i32
    return %c0_i32, %arg1 : i32, i32
  }
  func.func @transform_3(%arg0: i32, %arg1: i32) -> (i32, i32) {
    %c0_i32 = arith.constant 0 : i32
    %c0_i32_0 = arith.constant 0 : i32
    return %arg1, %c0_i32 : i32, i32
  }
  func.func @transform_4(%arg0: i32, %arg1: i32) -> (i32, i32) {
    %c0_i32 = arith.constant 0 : i32
    %c0_i32_0 = arith.constant 0 : i32
    %c0_i32_1 = arith.constant 0 : i32
    return %c0_i32, %c0_i32_0 : i32, i32
  }
  func.func @transform_5(%arg0: i32, %arg1: i32) -> (i32, i32) {
    %c0_i32 = arith.constant 0 : i32
    %c0_i32_0 = arith.constant 0 : i32
    return %arg0, %c0_i32 : i32, i32
  }
}

</mosaic_0001>

<bundles_post_ra>
// kernel: tpu_custom_call.1
= control target key start
LH: loop header
LB: loop body
LE: loop exit
PB: predicated region body
PF: predicated region fallthrough
CT: control target
= control target key end

     0   :  { %s1066_s18 = smov 0   ;;  %s1068_s19 = smov 0   ;;  %s1248_s0 = inlined_call_operand.vmem [shape: f32[256,32], index: 0, kind: input, shape index: {}]   ;;  %s1249_s1 = inlined_call_operand.vmem [shape: bf16[32,64], index: 1, kind: input, shape index: {}]   ;;  %s1250_s2 = inlined_call_operand.vmem [shape: f32[1,64], index: 2, kind: input, shape index: {}]   ;;  %s1251_s3 = inlined_call_operand.vmem [shape: bf16[64,8], index: 3, kind: input, shape index: {}]   ;;  %s1252_s4 = inlined_call_operand.vmem [shape: f32[1,8], index: 4, kind: input, shape index: {}]   ;;  %s1253_s5 = inlined_call_operand.vmem [shape: f32[256,8], index: 5, kind: output, shape index: {}]  }
   0x1   :  { %s1070_s20 = smov 0  }
   0x2 LB: > { %s27_s21 = sadd.s32 1, %s1029_s19  ;;  %p883_p0 = scmp.ge.s32.totalorder %s1033_s20, 1  ;;  %s1033_s20 = sphi %s1070_s20, %s15_s20   ;;  %s1029_s19 = sphi %s1068_s19, %s1255_s19   ;;  %s1025_s18 = sphi %s1066_s18, %s1254_s18  }
   0x3   : > { %p29_p1 = scmp.ge.s32.totalorder %s27_s21, 2  ;;  %p228_p2 = scmp.lt.s32.totalorder %s1033_s20, 3 }
   0x5   : > { %s1257_s21 = smov (%p29_p1, %s27_s21), 0  ;;  %p229_p3 = pnand %p883_p0, %p228_p2 }
   0x6   : > { %v1005_v0 = vld [vmem:[%s1249_s1] sm:$0xff] (!%p229_p3)   ;;  %s884_s24 = sshll.u32 (!%p229_p3), %s1025_s18, 4  ;;  %v1006_v1 = vld [vmem:[%s1249_s1 + $0x8] sm:$0xff] (!%p229_p3)   ;;  %vm362_vm0 = vcmask (!%p229_p3), 261120   ;;  %v1009_v28 = vld [vmem:[%s1251_s3 + $0x10] sm:$0xff] (!%p229_p3)   ;;  %vm298_vm1 = vcmask (!%p229_p3), 64512  }
   0x7   : > { %232 = sbr.rel (%p229_p3) target bundleno = 495 (0x1ef), region = 40  ;;  %p269_p4 = scmp.lt.s32.totalorder (!%p229_p3), %s884_s24, 31  ;;  %936 = vmatprep.subr.bf16.mxu0 (!%p229_p3), %v1005_v0  ;;  %v1007_v2 = vld [vmem:[%s1251_s3] sm:$0xff] (!%p229_p3)   ;;  %v1008_v3 = vld [vmem:[%s1251_s3 + $0x8] sm:$0xff] (!%p229_p3)   ;;  %v1010_v29 = vld [vmem:[%s1251_s3 + $0x18] sm:$0xff] (!%p229_p3)   ;;  %v1035_v30 = vmov (!%p229_p3), 0.0  }
   0x8   : > { %937 = vmatpush3.bf16.msra.mxu0 (!%p229_p3), %v1005_v0  ;;  %956 = vmatprep.subr.bf16.mxu1 (!%p229_p3), %v1007_v2  ;;  %301 = vst.msk [vmem:[#allocation2 + $0x10] sm:$0xff] (!%p229_p3), %vm298_vm1, %v1035_v30  ;;  %299 = vst.msk [vmem:[#allocation2] sm:$0xff] (!%p229_p3), %vm298_vm1, %v1035_v30  ;;  %v888_v31 = vld [vmem:[%s1250_s2] ss:$0 sm:$0xff] (!%p229_p3)  ;;  %vm556_vm2 = vcmask (!%p229_p3), 523264  }
   0x9   : > { %938 = vmatprep.subr.bf16.mxu0 (!%p229_p3), %v1006_v1  ;;  %957 = vmatpush3.bf16.msra.mxu1 (!%p229_p3), %v1007_v2  ;;  %300 = vst.msk [vmem:[#allocation2 + $0x8] sm:$0xff] (!%p229_p3), %vm298_vm1, %v1035_v30  ;;  %302 = vst.msk [vmem:[#allocation2 + $0x18] sm:$0xff] (!%p229_p3), %vm298_vm1, %v1035_v30 }
   0xa   : > { %958 = vmatprep.subr.bf16.mxu1 (!%p229_p3), %v1008_v3  ;;  %303 = vst.msk [vmem:[#allocation2 + $0x20] sm:$0xff] (!%p229_p3), %vm298_vm1, %v1035_v30  ;;  %304 = vst.msk [vmem:[#allocation2 + $0x28] sm:$0xff] (!%p229_p3), %vm298_vm1, %v1035_v30 }
   0xb   : > { %305 = vst.msk [vmem:[#allocation2 + $0x30] sm:$0xff] (!%p229_p3), %vm298_vm1, %v1035_v30  ;;  %306 = vst.msk [vmem:[#allocation2 + $0x38] sm:$0xff] (!%p229_p3), %vm298_vm1, %v1035_v30 }
   0xc   : > { %939 = vmatpush3.bf16.msra.mxu0 (!%p229_p3), %v1006_v1  ;;  %307 = vst.msk [vmem:[#allocation2 + $0x40] sm:$0xff] (!%p229_p3), %vm298_vm1, %v1035_v30  ;;  %308 = vst.msk [vmem:[#allocation2 + $0x48] sm:$0xff] (!%p229_p3), %vm298_vm1, %v1035_v30 }
   0xd   : > { %959 = vmatpush3.bf16.msra.mxu1 (!%p229_p3), %v1008_v3  ;;  %309 = vst.msk [vmem:[#allocation2 + $0x50] sm:$0xff] (!%p229_p3), %vm298_vm1, %v1035_v30  ;;  %310 = vst.msk [vmem:[#allocation2 + $0x58] sm:$0xff] (!%p229_p3), %vm298_vm1, %v1035_v30 }
   0xe   : > { %s1259_s24 = smov (!%p269_p4, %s884_s24), 31  ;;  %960 = vmatprep.subr.bf16.mxu1 %v1009_v28  ;;  %311 = vst.msk [vmem:[#allocation2 + $0x60] sm:$0xff] %vm298_vm1, %v1035_v30  ;;  %312 = vst.msk [vmem:[#allocation2 + $0x68] sm:$0xff] %vm298_vm1, %v1035_v30 }
   0xf   : > { %s885_s6 = sshll.u32 %s1259_s24, 3  ;;  %313 = vst.msk [vmem:[#allocation2 + $0x70] sm:$0xff] %vm298_vm1, %v1035_v30  ;;  %314 = vst.msk [vmem:[#allocation2 + $0x78] sm:$0xff] %vm298_vm1, %v1035_v30 }
  0x10   : > { %s1104_s9 = scalar_lea.vmem %s1248_s0, %s885_s6  ;;  %v501_v30 = vld [vmem:[#allocation2 + $0x8] sm:$0xff]  ;;  %s1177_s23 = scalar_lea.vmem %s1253_s5, %s885_s6 }
  0x11   : > { %v315_v4 = vld [vmem:[%s1104_s9] sm:$0xff]  ;;  %v316_v5 = vld [vmem:[%s1104_s9 + $0x8] sm:$0xff]  ;;  %v317_v6 = vld [vmem:[%s1104_s9 + $0x10] sm:$0xff]  ;;  %961 = vmatpush3.bf16.msra.mxu1 %v1009_v28 }
  0x12   : > { %v331_v7 = vpack.c.bf16 %v316_v5, %v315_v4  ;;  %v318_v8 = vld [vmem:[%s1104_s9 + $0x18] sm:$0xff]  ;;  %v319_v9 = vld [vmem:[%s1104_s9 + $0x20] sm:$0xff]  ;;  %v320_v10 = vld [vmem:[%s1104_s9 + $0x28] sm:$0xff]  ;;  %962 = vmatprep.subr.bf16.mxu1 %v1010_v29 }
  0x13   : > { %v332_v11 = vpack.c.bf16 %v318_v8, %v317_v6  ;;  %v333_v12 = vpack.c.bf16 %v320_v10, %v319_v9  ;;  %v321_v13 = vld [vmem:[%s1104_s9 + $0x30] sm:$0xff]  ;;  %v322_v14 = vld [vmem:[%s1104_s9 + $0x38] sm:$0xff]  ;;  %v323_v15 = vld [vmem:[%s1104_s9 + $0x40] sm:$0xff] }
  0x14   : > { %940 = vmatprep.mubr.msk.bf16.mxu0 %vm362_vm0, %v331_v7  ;;  %v324_v16 = vld [vmem:[%s1104_s9 + $0x48] sm:$0xff]  ;;  %v334_v17 = vpack.c.bf16 %v322_v14, %v321_v13  ;;  %v325_v19 = vld [vmem:[%s1104_s9 + $0x50] sm:$0xff]  ;;  %v326_v20 = vld [vmem:[%s1104_s9 + $0x58] sm:$0xff] }
  0x15   : > { %941 = vmatmul.mubr.msk.bf16.vlgmr.msra.gmra.mrb[0].mxu0 %vm362_vm0, %v332_v11  ;;  %v335_v18 = vpack.c.bf16 %v324_v16, %v323_v15  ;;  %v327_v21 = vld [vmem:[%s1104_s9 + $0x60] sm:$0xff]  ;;  %v328_v22 = vld [vmem:[%s1104_s9 + $0x68] sm:$0xff]  ;;  %v336_v23 = vpack.c.bf16 %v326_v20, %v325_v19  ;;  %v329_v25 = vld [vmem:[%s1104_s9 + $0x70] sm:$0xff]  ;;  %963 = vmatpush3.bf16.msra.mxu1 %v1010_v29 }
  0x16   : > { %944 = vmatprep.mubr.msk.bf16.mxu0 %vm362_vm0, %v333_v12  ;;  %v337_v24 = vpack.c.bf16 %v328_v22, %v327_v21  ;;  %v330_v26 = vld [vmem:[%s1104_s9 + $0x78] sm:$0xff] }
  0x17   : > { %v338_v27 = vpack.c.bf16 %v330_v26, %v329_v25  ;;  %v500_v25 = vld [vmem:[#allocation2] sm:$0xff] }
  0x1d   : > { %945 = vmatmul.mubr.msk.bf16.gmra.mrb[4].mxu0 %vm362_vm0, %v334_v17 }
  0x1e   : > { %948 = vmatprep.mubr.msk.bf16.mxu0 %vm362_vm0, %v335_v18 }
  0x25   : > { %949 = vmatmul.mubr.msk.bf16.gmra.mrb[8].mxu0 %vm362_vm0, %v336_v23 }
  0x26   : > { %952 = vmatprep.mubr.msk.bf16.mxu0 %vm362_vm0, %v337_v24  ;;  %v502_v24 = vld [vmem:[#allocation2 + $0x10] sm:$0xff] }
  0x2d   : > { %953 = vmatmul.mubr.msk.bf16.gmra.mrb[12].mxu0 %vm362_vm0, %v338_v27  ;;  %v503_v27 = vld [vmem:[#allocation2 + $0x18] sm:$0xff] }
  0xe8   : > { %v942_v32 = vpop.f32.mrb[0].mxu0 }
  0xe9   : > { %v430_v33 = vadd.f32 %v942_v32, %v888_v31  ;;  %v421_v34 = vpop.f32.mrb[1].mxu0 }
  0xea   : > { %v422_v35 = vadd.f32 %v888_v31, %v421_v34  ;;  %v943_v36 = vpop.f32.mrb[2].mxu0 }
  0xeb   : > { %v433_v37 = vadd.f32 %v943_v36, %v888_v31  ;;  %v424_v38 = vpop.f32.mrb[3].mxu0  ;;  %v486_v40 = vmax.f32 %v430_v33, 0.0  ;;  %v506_v36 = vld [vmem:[#allocation2 + $0x30] sm:$0xff] }
  0xec   : > { %v425_v39 = vadd.f32 %v888_v31, %v424_v38  ;;  %v484_v42 = vmax.f32 %v422_v35, 0.0  ;;  %v1170_v38 = vld [vmem:[%s1252_s4] ss:$0 sm:$0xff] }
  0xed   : > { %v487_v41 = vmax.f32 %v433_v37, 0.0  ;;  %v504_v37 = vld [vmem:[#allocation2 + $0x20] sm:$0xff] }
  0xee   : > { %v485_v43 = vmax.f32 %v425_v39, 0.0 }
  0xef   : > { %v517_v44 = vpack.c.bf16 %v487_v41, %v486_v40  ;;  %v507_v40 = vld [vmem:[#allocation2 + $0x38] sm:$0xff] }
  0xf0   : > { %v946_v45 = vpop.f32.mrb[4].mxu0  ;;  %v516_v46 = vpack.c.bf16 %v485_v43, %v484_v42  ;;  %v505_v43 = vld [vmem:[#allocation2 + $0x28] sm:$0xff] }
  0xf1   : > { %v446_v47 = vadd.f32 %v946_v45, %v888_v31  ;;  %v437_v48 = vpop.f32.mrb[5].mxu0 }
  0xf2   : > { %v438_v49 = vadd.f32 %v888_v31, %v437_v48  ;;  %v947_v50 = vpop.f32.mrb[6].mxu0  ;;  %964 = vmatprep.mubr.msk.bf16.mxu1 %vm556_vm2, %v516_v46 }
  0xf3   : > { %v449_v51 = vadd.f32 %v947_v50, %v888_v31  ;;  %v440_v52 = vpop.f32.mrb[7].mxu0  ;;  %965 = vmatmul.mubr.msk.bf16.vlgmr.msra.gmra.mrb[0].mxu1 %vm556_vm2, %v517_v44  ;;  %v490_v54 = vmax.f32 %v446_v47, 0.0 }
  0xf4   : > { %v441_v53 = vadd.f32 %v888_v31, %v440_v52  ;;  %v488_v56 = vmax.f32 %v438_v49, 0.0 }
  0xf5   : > { %v491_v55 = vmax.f32 %v449_v51, 0.0 }
  0xf6   : > { %v489_v57 = vmax.f32 %v441_v53, 0.0 }
  0xf7   : > { %v519_v58 = vpack.c.bf16 %v491_v55, %v490_v54 }
  0xf8   : > { %v518_v59 = vpack.c.bf16 %v489_v57, %v488_v56  ;;  %v950_v60 = vpop.f32.mrb[8].mxu0  ;;  %v510_v57 = vld [vmem:[#allocation2 + $0x50] sm:$0xff] }
  0xf9   : > { %v462_v61 = vadd.f32 %v950_v60, %v888_v31  ;;  %v453_v62 = vpop.f32.mrb[9].mxu0  ;;  %v511_v60 = vld [vmem:[#allocation2 + $0x58] sm:$0xff] }
  0xfa   : > { %v454_v63 = vadd.f32 %v888_v31, %v453_v62  ;;  %v951_v0 = vpop.f32.mrb[10].mxu0  ;;  %968 = vmatprep.mubr.msk.bf16.mxu1 %vm556_vm2, %v518_v59 }
  0xfb   : > { %v465_v1 = vadd.f32 %v951_v0, %v888_v31  ;;  %v456_v2 = vpop.f32.mrb[11].mxu0  ;;  %969 = vmatmul.mubr.msk.bf16.gmra.mrb[4].mxu1 %vm556_vm2, %v519_v58  ;;  %v494_v4 = vmax.f32 %v462_v61, 0.0  ;;  %v508_v58 = vld [vmem:[#allocation2 + $0x40] sm:$0xff] }
  0xfc   : > { %v457_v3 = vadd.f32 %v888_v31, %v456_v2  ;;  %v492_v6 = vmax.f32 %v454_v63, 0.0  ;;  %v509_v63 = vld [vmem:[#allocation2 + $0x48] sm:$0xff] }
  0xfd   : > { %v495_v5 = vmax.f32 %v465_v1, 0.0 }
  0xfe   : > { %v493_v7 = vmax.f32 %v457_v3, 0.0 }
  0xff   : > { %v521_v8 = vpack.c.bf16 %v495_v5, %v494_v4 }
 0x100   : > { %v520_v9 = vpack.c.bf16 %v493_v7, %v492_v6  ;;  %v954_v10 = vpop.f32.mrb[12].mxu0 }
 0x101   : > { %v478_v11 = vadd.f32 %v954_v10, %v888_v31  ;;  %v469_v12 = vpop.f32.mrb[13].mxu0 }
 0x102   : > { %v470_v13 = vadd.f32 %v888_v31, %v469_v12  ;;  %v955_v14 = vpop.f32.mrb[14].mxu0  ;;  %972 = vmatprep.mubr.msk.bf16.mxu1 %vm556_vm2, %v520_v9 }
 0x103   : > { %v481_v15 = vadd.f32 %v955_v14, %v888_v31  ;;  %v472_v16 = vpop.f32.mrb[15].mxu0  ;;  %973 = vmatmul.mubr.msk.bf16.gmra.mrb[8].mxu1 %vm556_vm2, %v521_v8  ;;  %v498_v18 = vmax.f32 %v478_v11, 0.0  ;;  %v512_v14 = vld [vmem:[#allocation2 + $0x60] sm:$0xff] }
 0x104   : > { %v473_v17 = vadd.f32 %v888_v31, %v472_v16  ;;  %v496_v20 = vmax.f32 %v470_v13, 0.0  ;;  %v514_v13 = vld [vmem:[#allocation2 + $0x70] sm:$0xff]  ;;  %v515_v16 = vld [vmem:[#allocation2 + $0x78] sm:$0xff] }
 0x105   : > { %v499_v19 = vmax.f32 %v481_v15, 0.0 }
 0x106   : > { %v497_v21 = vmax.f32 %v473_v17, 0.0 }
 0x107   : > { %v523_v22 = vpack.c.bf16 %v499_v19, %v498_v18  ;;  %v513_v19 = vld [vmem:[#allocation2 + $0x68] sm:$0xff] }
 0x108   : > { %v522_v23 = vpack.c.bf16 %v497_v21, %v496_v20 }
 0x10a   : > { %976 = vmatprep.mubr.msk.bf16.mxu1 %vm556_vm2, %v522_v23 }
 0x10b   : > { %977 = vmatmul.mubr.msk.bf16.gmra.mrb[12].mxu1 %vm556_vm2, %v523_v22 }
 0x1c6   : > { %v966_v26 = vpop.f32.mrb[0].mxu1 }
 0x1c7   : > { %v680_v28 = vadd.f32 %v966_v26, %v502_v24  ;;  %v615_v29 = vpop.f32.mrb[1].mxu1 }
 0x1c8   : > { %v678_v32 = vadd.f32 %v615_v29, %v500_v25  ;;  %v967_v33 = vpop.f32.mrb[2].mxu1 }
 0x1c9   : > { %697 = vst.msk [vmem:[#allocation2 + $0x10] sm:$0xff] %vm298_vm1, %v680_v28  ;;  %v681_v31 = vadd.f32 %v967_v33, %v503_v27  ;;  %v618_v34 = vpop.f32.mrb[3].mxu1 }
 0x1ca   : > { %695 = vst.msk [vmem:[#allocation2] sm:$0xff] %vm298_vm1, %v678_v32  ;;  %v679_v35 = vadd.f32 %v618_v34, %v501_v30 }
 0x1cb   : > { %698 = vst.msk [vmem:[#allocation2 + $0x18] sm:$0xff] %vm298_vm1, %v681_v31 }
 0x1cc   : > { %696 = vst.msk [vmem:[#allocation2 + $0x8] sm:$0xff] %vm298_vm1, %v679_v35 }
 0x1ce   : > { %v970_v39 = vpop.f32.mrb[4].mxu1 }
 0x1cf   : > { %v684_v41 = vadd.f32 %v970_v39, %v506_v36  ;;  %v631_v42 = vpop.f32.mrb[5].mxu1 }
 0x1d0   : > { %v716_v44 = vld [vmem:[#allocation2 + $0x10] sm:$0xff]  ;;  %v682_v45 = vadd.f32 %v631_v42, %v504_v37  ;;  %v971_v46 = vpop.f32.mrb[6].mxu1 }
 0x1d1   : > { %v739_v47 = vadd.f32 %v1170_v38, %v716_v44  ;;  %v714_v48 = vld [vmem:[#allocation2] sm:$0xff]  ;;  %701 = vst.msk [vmem:[#allocation2 + $0x30] sm:$0xff] %vm298_vm1, %v684_v41  ;;  %v685_v49 = vadd.f32 %v971_v46, %v507_v40  ;;  %v634_v50 = vpop.f32.mrb[7].mxu1 }
 0x1d2   : > { %v737_v51 = vadd.f32 %v1170_v38, %v714_v48  ;;  %v717_v52 = vld [vmem:[#allocation2 + $0x18] sm:$0xff]  ;;  %699 = vst.msk [vmem:[#allocation2 + $0x20] sm:$0xff] %vm298_vm1, %v682_v45  ;;  %v683_v53 = vadd.f32 %v634_v50, %v505_v43 }
 0x1d3   : > { %755 = vst.msk [vmem:[%s1177_s23 + $0x10] sm:$0xff] %vm298_vm1, %v739_v47  ;;  %v740_v54 = vadd.f32 %v1170_v38, %v717_v52  ;;  %v715_v55 = vld [vmem:[#allocation2 + $0x8] sm:$0xff]  ;;  %702 = vst.msk [vmem:[#allocation2 + $0x38] sm:$0xff] %vm298_vm1, %v685_v49 }
 0x1d4   : > { %753 = vst.msk [vmem:[%s1177_s23] sm:$0xff] %vm298_vm1, %v737_v51  ;;  %v738_v56 = vadd.f32 %v1170_v38, %v715_v55  ;;  %700 = vst.msk [vmem:[#allocation2 + $0x28] sm:$0xff] %vm298_vm1, %v683_v53 }
 0x1d5   : > { %756 = vst.msk [vmem:[%s1177_s23 + $0x18] sm:$0xff] %vm298_vm1, %v740_v54 }
 0x1d6   : > { %754 = vst.msk [vmem:[%s1177_s23 + $0x8] sm:$0xff] %vm298_vm1, %v738_v56  ;;  %v974_v59 = vpop.f32.mrb[8].mxu1 }
 0x1d7   : > { %v688_v61 = vadd.f32 %v974_v59, %v510_v57  ;;  %v647_v62 = vpop.f32.mrb[9].mxu1 }
 0x1d8   : > { %v720_v0 = vld [vmem:[#allocation2 + $0x30] sm:$0xff]  ;;  %v686_v1 = vadd.f32 %v647_v62, %v508_v58  ;;  %v975_v2 = vpop.f32.mrb[10].mxu1 }
 0x1d9   : > { %v743_v3 = vadd.f32 %v1170_v38, %v720_v0  ;;  %v718_v4 = vld [vmem:[#allocation2 + $0x20] sm:$0xff]  ;;  %705 = vst.msk [vmem:[#allocation2 + $0x50] sm:$0xff] %vm298_vm1, %v688_v61  ;;  %v689_v5 = vadd.f32 %v975_v2, %v511_v60  ;;  %v650_v6 = vpop.f32.mrb[11].mxu1 }
 0x1da   : > { %v741_v7 = vadd.f32 %v1170_v38, %v718_v4  ;;  %v721_v8 = vld [vmem:[#allocation2 + $0x38] sm:$0xff]  ;;  %703 = vst.msk [vmem:[#allocation2 + $0x40] sm:$0xff] %vm298_vm1, %v686_v1  ;;  %v687_v9 = vadd.f32 %v650_v6, %v509_v63 }
 0x1db   : > { %759 = vst.msk [vmem:[%s1177_s23 + $0x30] sm:$0xff] %vm298_vm1, %v743_v3  ;;  %v744_v10 = vadd.f32 %v1170_v38, %v721_v8  ;;  %v719_v11 = vld [vmem:[#allocation2 + $0x28] sm:$0xff]  ;;  %706 = vst.msk [vmem:[#allocation2 + $0x58] sm:$0xff] %vm298_vm1, %v689_v5 }
 0x1dc   : > { %757 = vst.msk [vmem:[%s1177_s23 + $0x20] sm:$0xff] %vm298_vm1, %v741_v7  ;;  %v742_v12 = vadd.f32 %v1170_v38, %v719_v11  ;;  %704 = vst.msk [vmem:[#allocation2 + $0x48] sm:$0xff] %vm298_vm1, %v687_v9 }
 0x1dd   : > { %760 = vst.msk [vmem:[%s1177_s23 + $0x38] sm:$0xff] %vm298_vm1, %v744_v10 }
 0x1de   : > { %758 = vst.msk [vmem:[%s1177_s23 + $0x28] sm:$0xff] %vm298_vm1, %v742_v12  ;;  %v978_v15 = vpop.f32.mrb[12].mxu1 }
 0x1df   : > { %v692_v17 = vadd.f32 %v978_v15, %v514_v13  ;;  %v663_v18 = vpop.f32.mrb[13].mxu1 }
 0x1e0   : > { %v724_v20 = vld [vmem:[#allocation2 + $0x50] sm:$0xff]  ;;  %v690_v21 = vadd.f32 %v663_v18, %v512_v14  ;;  %v979_v22 = vpop.f32.mrb[14].mxu1 }
 0x1e1   : > { %v747_v23 = vadd.f32 %v1170_v38, %v724_v20  ;;  %v722_v24 = vld [vmem:[#allocation2 + $0x40] sm:$0xff]  ;;  %709 = vst.msk [vmem:[#allocation2 + $0x70] sm:$0xff] %vm298_vm1, %v692_v17  ;;  %v693_v25 = vadd.f32 %v979_v22, %v515_v16  ;;  %v666_v26 = vpop.f32.mrb[15].mxu1 }
 0x1e2   : > { %v745_v27 = vadd.f32 %v1170_v38, %v722_v24  ;;  %v725_v28 = vld [vmem:[#allocation2 + $0x58] sm:$0xff]  ;;  %707 = vst.msk [vmem:[#allocation2 + $0x60] sm:$0xff] %vm298_vm1, %v690_v21  ;;  %v691_v29 = vadd.f32 %v666_v26, %v513_v19 }
 0x1e3   : > { %763 = vst.msk [vmem:[%s1177_s23 + $0x50] sm:$0xff] %vm298_vm1, %v747_v23  ;;  %v748_v30 = vadd.f32 %v1170_v38, %v725_v28  ;;  %v723_v32 = vld [vmem:[#allocation2 + $0x48] sm:$0xff]  ;;  %710 = vst.msk [vmem:[#allocation2 + $0x78] sm:$0xff] %vm298_vm1, %v693_v25 }
 0x1e4   : > { %761 = vst.msk [vmem:[%s1177_s23 + $0x40] sm:$0xff] %vm298_vm1, %v745_v27  ;;  %v746_v33 = vadd.f32 %v1170_v38, %v723_v32  ;;  %708 = vst.msk [vmem:[#allocation2 + $0x68] sm:$0xff] %vm298_vm1, %v691_v29 }
 0x1e5   : > { %764 = vst.msk [vmem:[%s1177_s23 + $0x58] sm:$0xff] %vm298_vm1, %v748_v30 }
 0x1e6   : > { %762 = vst.msk [vmem:[%s1177_s23 + $0x48] sm:$0xff] %vm298_vm1, %v746_v33 }
 0x1e8   : > { %v728_v31 = vld [vmem:[#allocation2 + $0x70] sm:$0xff] }
 0x1e9   : > { %v751_v34 = vadd.f32 %v1170_v38, %v728_v31  ;;  %v726_v35 = vld [vmem:[#allocation2 + $0x60] sm:$0xff] }
 0x1ea   : > { %v749_v36 = vadd.f32 %v1170_v38, %v726_v35  ;;  %v729_v37 = vld [vmem:[#allocation2 + $0x78] sm:$0xff] }
 0x1eb   : > { %767 = vst.msk [vmem:[%s1177_s23 + $0x70] sm:$0xff] %vm298_vm1, %v751_v34  ;;  %v752_v39 = vadd.f32 %v1170_v38, %v729_v37  ;;  %v727_v40 = vld [vmem:[#allocation2 + $0x68] sm:$0xff] }
 0x1ec   : > { %765 = vst.msk [vmem:[%s1177_s23 + $0x60] sm:$0xff] %vm298_vm1, %v749_v36  ;;  %v750_v41 = vadd.f32 %v1170_v38, %v727_v40 }
 0x1ed   : > { %768 = vst.msk [vmem:[%s1177_s23 + $0x78] sm:$0xff] %vm298_vm1, %v752_v39 }
 0x1ee   : > { %766 = vst.msk [vmem:[%s1177_s23 + $0x68] sm:$0xff] %vm298_vm1, %v750_v41 }
 0x1ef PF: > { %s15_s20 = sadd.s32 1, %s1033_s20   ;;  %s1254_s18 = smov %s1029_s19 }
 0x1f0   : > { %p12_p5 = scmp.ge.s32.totalorder %s15_s20, 4   ;;  %s1255_s19 = smov %s1257_s21 }
 0x1f2   :  { %14 = sbr.rel (!%p12_p5) target bundleno = 2 (0x2), region = 87 }

</bundles_post_ra>
